<compile_context>
chip_gen: v7x
topology: tpu7x:2x2x1
jax: 0.10.0
libtpu: 0.0.40
codegen_flags: <defaults>
</compile_context>

<pallas_src>
import functools

import jax
import jax.numpy as jnp
from jax.experimental import pallas as pl
from jax.experimental.pallas import tpu as pltpu

_NC = 8  # xyz coords zero-padded 3 -> 8 so coord contractions are one MXU pass


def _fused_kernel(bins,
                  x_ref, pts_ref,
                  ew1_ref, eb1_ref, ew2_ref, eb2_ref,
                  emb_ref, embt_ref, e2_ref, isig_ref,
                  wp_ref, dw1_ref, db1_ref, dw2_ref, db2_ref,
                  ze_ref, zq_ref, cnt_ref, logit_ref):
    bt, n_lat, nc = x_ref.shape
    n_pts = pts_ref.shape[1]
    num_codes, dim = emb_ref.shape

    # ----------------------------- Encoder ---------------------------------
    # TODO(synk): reference Encoder uses furthest-point-sampling + kNN grouping
    # + transformer blocks; stand-in: centers = first n_lat input points,
    # embedded by a 2-layer MLP.
    centers = x_ref[...]                                   # (Bt, Nlat, 8) padded coords
    centers_f = centers.reshape(bt * n_lat, nc)            # M = Bt*Nlat rows
    h = jnp.maximum(
        jnp.dot(centers_f, ew1_ref[...], preferred_element_type=jnp.float32)
        + eb1_ref[...], 0.0)
    z_e = jnp.dot(h, ew2_ref[...], preferred_element_type=jnp.float32) + eb2_ref[...]
    ze_ref[...] = z_e.reshape(bt, n_lat, dim)

    # ------------------------- VectorQuantizer2 ----------------------------
    # argmin_k ||z - e_k||^2 == argmin_k (||e_k||^2 - 2 z.e_k); ||z||^2 is a
    # per-row constant and is dropped (exact).  e2 / e^T precomputed in wrapper.
    d = e2_ref[...] - 2.0 * jnp.dot(z_e, embt_ref[...],
                                    preferred_element_type=jnp.float32)     # (Bt*Nlat, K)
    iota = jax.lax.broadcasted_iota(jnp.int32, d.shape, 1)
    dmin = jnp.min(d, axis=-1, keepdims=True)
    first = jnp.min(jnp.where(d <= dmin, iota, num_codes), axis=-1, keepdims=True)
    onehot = (iota == first).astype(jnp.float32)           # (Bt*Nlat, K), lowest-index tie-break
    z_q = jnp.dot(onehot, emb_ref[...], preferred_element_type=jnp.float32)  # gather as matmul
    z_q_b = z_q.reshape(bt, n_lat, dim)
    zq_ref[...] = z_q_b
    cnt_ref[0] = jnp.sum(onehot, axis=0, keepdims=True)    # (1, K) code counts for this block

    # --- centers quantize / dequantize (PyTorch: .long(), then hard-coded /255) ---
    cq = ((centers + 1.0) * 0.5 * (bins - 1)).astype(jnp.int32)
    coord_mask = (jax.lax.broadcasted_iota(jnp.int32, (1, 1, nc), 2) < 3).astype(jnp.float32)
    c_dq = (cq.astype(jnp.float32) / 255.0 * 2.0 - 1.0) * coord_mask   # zero the pad coords

    # ----------------------------- Decoder ---------------------------------
    # TODO(synk): reference Decoder uses learned positional embeddings +
    # cross-attention blocks; stand-in: RBF-weighted latent interpolation + MLP.
    pts = pts_ref[...]                                     # (Bt, P, 8) padded coords
    # p.p is KEPT: sigma is per-latent, so dropping it would change the softmax.
    p2 = jnp.sum(pts * pts, axis=-1, keepdims=True)        # (Bt, P, 1)
    c2 = jnp.sum(c_dq * c_dq, axis=-1)[:, None, :]         # (Bt, 1, Nlat)
    cross = jnp.einsum('bpd,bnd->bpn', pts, c_dq,
                       preferred_element_type=jnp.float32)  # (Bt, P, Nlat)
    d2 = p2 + c2 - 2.0 * cross
    logits_w = -d2 * isig_ref[...][None]                   # inv sigma precomputed (VPU mul)
    logits_w = logits_w - jnp.max(logits_w, axis=-1, keepdims=True)
    w = jnp.exp(logits_w)
    w = w * pl.reciprocal(jnp.sum(w, axis=-1, keepdims=True), approx=True)
    feat = jnp.einsum('bpn,bnd->bpd', w, z_q_b,
                      preferred_element_type=jnp.float32)   # (Bt, P, dim)

    feat_f = feat.reshape(bt * n_pts, dim)                  # M = Bt*P rows
    pts_f = pts.reshape(bt * n_pts, nc)
    h2 = jnp.maximum(
        jnp.dot(feat_f, dw1_ref[...], preferred_element_type=jnp.float32)
        + jnp.dot(pts_f, wp_ref[...], preferred_element_type=jnp.float32)
        + db1_ref[...], 0.0)                               # (Bt*P, Hd)
    # Final 1-wide projection as VPU multiply + lane reduce (no N=1 MXU pass),
    # written lane-dense: all Bt*P logits live in the lane dimension.
    out_row = jnp.sum(h2 * dw2_ref[...], axis=-1)[None, :] + db2_ref[...]   # (1, Bt*P)
    logit_ref[0] = out_row


def autoencoder_forward(params, x, points, bins=256, beta=0.25, block_b=None):
    B, m_pts, _ = x.shape
    P = points.shape[1]
    n_lat = params["dec_log_sigma"].shape[1]
    K, dim = params["codebook"].shape

    if block_b is None:
        block_b = B if B <= 8 else 8
    assert B % block_b == 0, "batch must be divisible by block_b"
    assert n_lat % 8 == 0 and P % 8 == 0, "n_lat and P must be sublane-aligned"
    assert m_pts >= n_lat
    G = B // block_b

    # ---- batch-invariant precomputes / layout plumbing (hoisted out of kernel) ----
    pad_w = lambda a: jnp.pad(a, ((0, _NC - 3), (0, 0)))            # (3,H) -> (8,H)
    x_pad = jnp.pad(x[:, :n_lat, :], ((0, 0), (0, 0), (0, _NC - 3)))  # only n_lat pts DMA'd
    pts_pad = jnp.pad(points, ((0, 0), (0, 0), (0, _NC - 3)))
    ew1_8 = pad_w(params["enc_w1"])
    wp8 = pad_w(params["dec_wp"])
    emb = params["codebook"]
    emb_t = emb.T                                                   # (dim, K)
    e2 = jnp.sum(emb * emb, axis=-1)[None, :]                       # (1, K)
    inv_sigma = 1.0 / (jnp.exp(params["dec_log_sigma"]) + 1e-6)     # (1, Nlat)
    dw2_row = params["dec_w2"].T                                    # (1, Hd)

    # Batch-invariant weights: constant index_map, single-buffered (no pointless
    # double-buffering of constants).
    full = lambda a: pl.BlockSpec(a.shape, lambda g: (0, 0),
                                  pipeline_mode=pl.Buffered(1))

    kern = functools.partial(_fused_kernel, bins)
    z_e, z_q, counts, logits_slab = pl.pallas_call(
        kern,
        grid=(G,),
        in_specs=[
            pl.BlockSpec((block_b, n_lat, _NC), lambda g: (g, 0, 0)),
            pl.BlockSpec((block_b, P, _NC), lambda g: (g, 0, 0)),
            full(ew1_8), full(params["enc_b1"]),
            full(params["enc_w2"]), full(params["enc_b2"]),
            full(emb), full(emb_t), full(e2), full(inv_sigma),
            full(wp8), full(params["dec_w1"]), full(params["dec_b1"]),
            full(dw2_row), full(params["dec_b2"]),
        ],
        out_specs=(
            pl.BlockSpec((block_b, n_lat, dim), lambda g: (g, 0, 0)),
            pl.BlockSpec((block_b, n_lat, dim), lambda g: (g, 0, 0)),
            pl.BlockSpec((1, 1, K), lambda g: (g, 0, 0)),
            pl.BlockSpec((1, 1, block_b * P), lambda g: (g, 0, 0)),   # lane-dense logits
        ),
        out_shape=(
            jax.ShapeDtypeStruct((B, n_lat, dim), jnp.float32),       # z_e
            jax.ShapeDtypeStruct((B, n_lat, dim), jnp.float32),       # z_q (pre straight-through)
            jax.ShapeDtypeStruct((G, 1, K), jnp.float32),             # code counts per grid step
            jax.ShapeDtypeStruct((G, 1, block_b * P), jnp.float32),   # occupancy logits
        ),
        compiler_params=pltpu.CompilerParams(
            dimension_semantics=("parallel",),
            vmem_limit_bytes=32 * 1024 * 1024),
    )(x_pad, pts_pad,
      ew1_8, params["enc_b1"], params["enc_w2"], params["enc_b2"],
      emb, emb_t, e2, inv_sigma,
      wp8, params["dec_w1"], params["dec_b1"], dw2_row, params["dec_b2"])

    # VQ losses / straight-through (forward values; detach() does not change them).
    # TODO(synk): training would need the per-term stop_gradient split
    # (codebook vs. commitment) plus a custom_vjp through the kernel.
    sq = jnp.mean((z_q - z_e) ** 2)
    loss_vq = sq + beta * sq
    z_q_st = z_e + jax.lax.stop_gradient(z_q - z_e)

    avg_probs = jnp.sum(counts, axis=(0, 1)) / (B * n_lat)
    perplexity = jnp.exp(-jnp.sum(avg_probs * jnp.log(avg_probs + 1e-10)))

    # sigma is batch-invariant -> compute once in JAX instead of storing per step.
    sigma = jnp.broadcast_to(jnp.exp(params["dec_log_sigma"]), (B, n_lat))
    logits = logits_slab.reshape(B, P)                      # free wrapper reshape

    return logits, z_e, z_q_st, sigma, loss_vq, perplexity


if __name__ == "__main__":
    # Small shapes consistent with the module's conventions:
    #   x: (B, Mpts, 3) input point cloud, points: (B, P, 3) query points.
    B, Mpts, Nlat, dim, K, P = 2, 64, 8, 32, 64, 16
    H_enc, H_dec = 64, 64

    key = jax.random.PRNGKey(0)
    ks = jax.random.split(key, 10)
    params = {
        "enc_w1": 0.1 * jax.random.normal(ks[0], (3, H_enc), jnp.float32),
        "enc_b1": jnp.zeros((1, H_enc), jnp.float32),
        "enc_w2": 0.1 * jax.random.normal(ks[1], (H_enc, dim), jnp.float32),
        "enc_b2": jnp.zeros((1, dim), jnp.float32),
        "codebook": jax.random.uniform(ks[2], (K, dim), jnp.float32, -1.0 / K, 1.0 / K),
        "dec_log_sigma": jnp.full((1, Nlat), -2.0, jnp.float32),
        "dec_wp": 0.1 * jax.random.normal(ks[3], (3, H_dec), jnp.float32),
        "dec_w1": 0.1 * jax.random.normal(ks[4], (dim, H_dec), jnp.float32),
        "dec_b1": jnp.zeros((1, H_dec), jnp.float32),
        "dec_w2": 0.1 * jax.random.normal(ks[5], (H_dec, 1), jnp.float32),
        "dec_b2": jnp.zeros((1, 1), jnp.float32),
    }

    x = jax.random.uniform(ks[6], (B, Mpts, 3), jnp.float32, -1.0, 1.0)
    points = jax.random.uniform(ks[7], (B, P, 3), jnp.float32, -1.0, 1.0)

    forward = jax.jit(functools.partial(autoencoder_forward))
    out = forward(params, x, points)
    jax.block_until_ready(out)

    logits, z_e_x, z_q_x, sigma, loss_vq, perplexity = out
    assert logits.shape == (B, P)
    assert z_e_x.shape == (B, Nlat, dim) and z_q_x.shape == (B, Nlat, dim)
    assert sigma.shape == (B, Nlat)
    assert loss_vq.shape == () and perplexity.shape == ()
    assert bool(jnp.all(jnp.isfinite(logits)))
    print("KERNEL_OK")
</pallas_src>

<mosaic_0001>
module attributes {stable_mosaic.version = 11 : i64} {
  func.func @_fused_kernel(%arg0: i32, %arg1: memref<2x8x8xf32, #tpu.memory_space<vmem>>, %arg2: memref<2x16x8xf32, #tpu.memory_space<vmem>>, %arg3: memref<8x64xf32, #tpu.memory_space<vmem>>, %arg4: memref<1x64xf32, #tpu.memory_space<vmem>>, %arg5: memref<64x32xf32, #tpu.memory_space<vmem>>, %arg6: memref<1x32xf32, #tpu.memory_space<vmem>>, %arg7: memref<64x32xf32, #tpu.memory_space<vmem>>, %arg8: memref<32x64xf32, #tpu.memory_space<vmem>>, %arg9: memref<1x64xf32, #tpu.memory_space<vmem>>, %arg10: memref<1x8xf32, #tpu.memory_space<vmem>>, %arg11: memref<8x64xf32, #tpu.memory_space<vmem>>, %arg12: memref<32x64xf32, #tpu.memory_space<vmem>>, %arg13: memref<1x64xf32, #tpu.memory_space<vmem>>, %arg14: memref<1x64xf32, #tpu.memory_space<vmem>>, %arg15: memref<1x1xf32, #tpu.memory_space<vmem>>, %arg16: memref<2x8x32xf32, #tpu.memory_space<vmem>>, %arg17: memref<2x8x32xf32, #tpu.memory_space<vmem>>, %arg18: memref<1x1x64xf32, #tpu.memory_space<vmem>>, %arg19: memref<1x1x32xf32, #tpu.memory_space<vmem>>) attributes {dimension_semantics = [#tpu.dimension_semantics<parallel>], iteration_bounds = array<i64: 1>, scalar_prefetch = 0 : i64, scratch_operands = 0 : i64, tpu.core_type = #tpu.core_type<tc>, window_params = [{transform_indices = @transform_0, window_bounds = array<i64: 2, 8, 8>}, {transform_indices = @transform_1, window_bounds = array<i64: 2, 16, 8>}, {pipeline_mode = #tpu.pipeline_mode<synchronous>, transform_indices = @transform_2, window_bounds = array<i64: 8, 64>}, {pipeline_mode = #tpu.pipeline_mode<synchronous>, transform_indices = @transform_3, window_bounds = array<i64: 1, 64>}, {pipeline_mode = #tpu.pipeline_mode<synchronous>, transform_indices = @transform_4, window_bounds = array<i64: 64, 32>}, {pipeline_mode = #tpu.pipeline_mode<synchronous>, transform_indices = @transform_5, window_bounds = array<i64: 1, 32>}, {pipeline_mode = #tpu.pipeline_mode<synchronous>, transform_indices = @transform_6, window_bounds = array<i64: 64, 32>}, {pipeline_mode = #tpu.pipeline_mode<synchronous>, transform_indices = @transform_7, window_bounds = array<i64: 32, 64>}, {pipeline_mode = #tpu.pipeline_mode<synchronous>, transform_indices = @transform_8, window_bounds = array<i64: 1, 64>}, {pipeline_mode = #tpu.pipeline_mode<synchronous>, transform_indices = @transform_9, window_bounds = array<i64: 1, 8>}, {pipeline_mode = #tpu.pipeline_mode<synchronous>, transform_indices = @transform_10, window_bounds = array<i64: 8, 64>}, {pipeline_mode = #tpu.pipeline_mode<synchronous>, transform_indices = @transform_11, window_bounds = array<i64: 32, 64>}, {pipeline_mode = #tpu.pipeline_mode<synchronous>, transform_indices = @transform_12, window_bounds = array<i64: 1, 64>}, {pipeline_mode = #tpu.pipeline_mode<synchronous>, transform_indices = @transform_13, window_bounds = array<i64: 1, 64>}, {pipeline_mode = #tpu.pipeline_mode<synchronous>, transform_indices = @transform_14, window_bounds = array<i64: 1, 1>}, {transform_indices = @transform_15, window_bounds = array<i64: 2, 8, 32>}, {transform_indices = @transform_16, window_bounds = array<i64: 2, 8, 32>}, {transform_indices = @transform_17, window_bounds = array<i64: 1, 1, 64>}, {transform_indices = @transform_18, window_bounds = array<i64: 1, 1, 32>}]} {
    %c0 = arith.constant 0 : index
    %c0_0 = arith.constant 0 : index
    %c0_1 = arith.constant 0 : index
    %0 = vector.load %arg1[%c0, %c0_0, %c0_1] : memref<2x8x8xf32, #tpu.memory_space<vmem>>, vector<2x8x8xf32>
    %1 = vector.shape_cast %0 : vector<2x8x8xf32> to vector<16x8xf32>
    %c0_2 = arith.constant 0 : index
    %c0_3 = arith.constant 0 : index
    %2 = vector.load %arg3[%c0_2, %c0_3] : memref<8x64xf32, #tpu.memory_space<vmem>>, vector<8x64xf32>
    %cst = arith.constant dense<0.000000e+00> : vector<16x64xf32>
    %3 = tpu.matmul %1, %2, %cst {dimension_numbers = #tpu.dot_dimension_numbers<[1], [0], [0], [1], [0, 0, 1, 1], [], []>} : vector<16x8xf32>, vector<8x64xf32>, vector<16x64xf32> -> vector<16x64xf32>
    %c0_4 = arith.constant 0 : index
    %c0_5 = arith.constant 0 : index
    %4 = vector.load %arg4[%c0_4, %c0_5] : memref<1x64xf32, #tpu.memory_space<vmem>>, vector<1x64xf32>
    %5 = vector.broadcast %4 : vector<1x64xf32> to vector<16x64xf32>
    %6 = arith.addf %3, %5 : vector<16x64xf32>
    %cst_6 = arith.constant 0.000000e+00 : f32
    %7 = vector.broadcast %cst_6 : f32 to vector<16x64xf32>
    %8 = arith.maximumf %6, %7 : vector<16x64xf32>
    %c0_7 = arith.constant 0 : index
    %c0_8 = arith.constant 0 : index
    %9 = vector.load %arg5[%c0_7, %c0_8] : memref<64x32xf32, #tpu.memory_space<vmem>>, vector<64x32xf32>
    %cst_9 = arith.constant dense<0.000000e+00> : vector<16x32xf32>
    %10 = tpu.matmul %8, %9, %cst_9 {dimension_numbers = #tpu.dot_dimension_numbers<[1], [0], [0], [1], [0, 0, 1, 1], [], []>} : vector<16x64xf32>, vector<64x32xf32>, vector<16x32xf32> -> vector<16x32xf32>
    %c0_10 = arith.constant 0 : index
    %c0_11 = arith.constant 0 : index
    %11 = vector.load %arg6[%c0_10, %c0_11] : memref<1x32xf32, #tpu.memory_space<vmem>>, vector<1x32xf32>
    %12 = vector.broadcast %11 : vector<1x32xf32> to vector<16x32xf32>
    %13 = arith.addf %10, %12 : vector<16x32xf32>
    %14 = vector.shape_cast %13 : vector<16x32xf32> to vector<2x8x32xf32>
    %c0_12 = arith.constant 0 : index
    %c0_13 = arith.constant 0 : index
    %c0_14 = arith.constant 0 : index
    %15 = vector.load %arg16[%c0_12, %c0_13, %c0_14] : memref<2x8x32xf32, #tpu.memory_space<vmem>>, vector<2x8x32xf32>
    tpu.vector_store %arg16[%c0_12, %c0_13, %c0_14], %14 {strides = array<i32>} : memref<2x8x32xf32, #tpu.memory_space<vmem>>, vector<2x8x32xf32>,
    %c0_15 = arith.constant 0 : index
    %c0_16 = arith.constant 0 : index
    %16 = vector.load %arg9[%c0_15, %c0_16] : memref<1x64xf32, #tpu.memory_space<vmem>>, vector<1x64xf32>
    %c0_17 = arith.constant 0 : index
    %c0_18 = arith.constant 0 : index
    %17 = vector.load %arg8[%c0_17, %c0_18] : memref<32x64xf32, #tpu.memory_space<vmem>>, vector<32x64xf32>
    %cst_19 = arith.constant dense<0.000000e+00> : vector<16x64xf32>
    %18 = tpu.matmul %13, %17, %cst_19 {dimension_numbers = #tpu.dot_dimension_numbers<[1], [0], [0], [1], [0, 0, 1, 1], [], []>} : vector<16x32xf32>, vector<32x64xf32>, vector<16x64xf32> -> vector<16x64xf32>
    %cst_20 = arith.constant 2.000000e+00 : f32
    %19 = vector.broadcast %cst_20 : f32 to vector<16x64xf32>
    %20 = arith.mulf %19, %18 : vector<16x64xf32>
    %21 = vector.broadcast %16 : vector<1x64xf32> to vector<16x64xf32>
    %22 = arith.subf %21, %20 : vector<16x64xf32>
    %23 = tpu.iota {dimensions = array<i32: 1>} : vector<16x64xi32>
    %cst_21 = arith.constant dense<0x7F800000> : vector<16xf32>
    %24 = vector.multi_reduction <minimumf>, %22, %cst_21 [1] : vector<16x64xf32> to vector<16xf32>
    %25 = vector.shape_cast %24 : vector<16xf32> to vector<16x1xf32>
    %26 = vector.broadcast %25 : vector<16x1xf32> to vector<16x64xf32>
    %27 = arith.cmpf ole, %22, %26 : vector<16x64xf32>
    %c64_i32 = arith.constant 64 : i32
    %28 = vector.broadcast %c64_i32 : i32 to vector<16x64xi32>
    %29 = arith.select %27, %23, %28 : vector<16x64xi1>, vector<16x64xi32>
    %cst_22 = arith.constant dense<2147483647> : vector<16xi32>
    %30 = vector.multi_reduction <minsi>, %29, %cst_22 [1] : vector<16x64xi32> to vector<16xi32>
    %31 = vector.shape_cast %30 : vector<16xi32> to vector<16x1xi32>
    %32 = vector.broadcast %31 : vector<16x1xi32> to vector<16x64xi32>
    %33 = arith.cmpi eq, %23, %32 : vector<16x64xi32>
    %34 = arith.extui %33 : vector<16x64xi1> to vector<16x64xi32>
    %35 = arith.sitofp %34 : vector<16x64xi32> to vector<16x64xf32>
    %c0_23 = arith.constant 0 : index
    %c0_24 = arith.constant 0 : index
    %36 = vector.load %arg7[%c0_23, %c0_24] : memref<64x32xf32, #tpu.memory_space<vmem>>, vector<64x32xf32>
    %cst_25 = arith.constant dense<0.000000e+00> : vector<16x32xf32>
    %37 = tpu.matmul %35, %36, %cst_25 {dimension_numbers = #tpu.dot_dimension_numbers<[1], [0], [0], [1], [0, 0, 1, 1], [], []>} : vector<16x64xf32>, vector<64x32xf32>, vector<16x32xf32> -> vector<16x32xf32>
    %38 = vector.shape_cast %37 : vector<16x32xf32> to vector<2x8x32xf32>
    %c0_26 = arith.constant 0 : index
    %c0_27 = arith.constant 0 : index
    %c0_28 = arith.constant 0 : index
    %39 = vector.load %arg17[%c0_26, %c0_27, %c0_28] : memref<2x8x32xf32, #tpu.memory_space<vmem>>, vector<2x8x32xf32>
    tpu.vector_store %arg17[%c0_26, %c0_27, %c0_28], %38 {strides = array<i32>} : memref<2x8x32xf32, #tpu.memory_space<vmem>>, vector<2x8x32xf32>,
    %cst_29 = arith.constant dense<0.000000e+00> : vector<64xf32>
    %40 = vector.multi_reduction <add>, %35, %cst_29 [0] : vector<16x64xf32> to vector<64xf32>
    %41 = vector.shape_cast %40 : vector<64xf32> to vector<1x64xf32>
    %c0_30 = arith.constant 0 : index
    %c0_31 = arith.constant 0 : index
    %c0_32 = arith.constant 0 : index
    %42 = vector.load %arg18[%c0_30, %c0_31, %c0_32] : memref<1x1x64xf32, #tpu.memory_space<vmem>>, vector<1x1x64xf32>
    %43 = vector.shape_cast %42 : vector<1x1x64xf32> to vector<1x64xf32>
    %44 = vector.shape_cast %41 : vector<1x64xf32> to vector<1x1x64xf32>
    tpu.vector_store %arg18[%c0_30, %c0_31, %c0_32], %44 {strides = array<i32>} : memref<1x1x64xf32, #tpu.memory_space<vmem>>, vector<1x1x64xf32>,
    %cst_33 = arith.constant 1.000000e+00 : f32
    %45 = vector.broadcast %cst_33 : f32 to vector<2x8x8xf32>
    %46 = arith.addf %0, %45 : vector<2x8x8xf32>
    %cst_34 = arith.constant 5.000000e-01 : f32
    %47 = vector.broadcast %cst_34 : f32 to vector<2x8x8xf32>
    %48 = arith.mulf %46, %47 : vector<2x8x8xf32>
    %cst_35 = arith.constant 2.550000e+02 : f32
    %49 = vector.broadcast %cst_35 : f32 to vector<2x8x8xf32>
    %50 = arith.mulf %48, %49 : vector<2x8x8xf32>
    %51 = arith.fptosi %50 : vector<2x8x8xf32> to vector<2x8x8xi32>
    %52 = tpu.iota {dimensions = array<i32: 2>} : vector<1x1x8xi32>
    %c3_i32 = arith.constant 3 : i32
    %53 = vector.broadcast %c3_i32 : i32 to vector<1x1x8xi32>
    %54 = arith.cmpi slt, %52, %53 : vector<1x1x8xi32>
    %55 = arith.extui %54 : vector<1x1x8xi1> to vector<1x1x8xi32>
    %56 = arith.sitofp %55 : vector<1x1x8xi32> to vector<1x1x8xf32>
    %57 = arith.sitofp %51 : vector<2x8x8xi32> to vector<2x8x8xf32>
    %cst_36 = arith.constant 2.550000e+02 : f32
    %58 = vector.broadcast %cst_36 : f32 to vector<2x8x8xf32>
    %59 = arith.divf %57, %58 : vector<2x8x8xf32>
    %cst_37 = arith.constant 2.000000e+00 : f32
    %60 = vector.broadcast %cst_37 : f32 to vector<2x8x8xf32>
    %61 = arith.mulf %59, %60 : vector<2x8x8xf32>
    %cst_38 = arith.constant 1.000000e+00 : f32
    %62 = vector.broadcast %cst_38 : f32 to vector<2x8x8xf32>
    %63 = arith.subf %61, %62 : vector<2x8x8xf32>
    %64 = vector.broadcast %56 : vector<1x1x8xf32> to vector<2x8x8xf32>
    %65 = arith.mulf %63, %64 : vector<2x8x8xf32>
    %c0_39 = arith.constant 0 : index
    %c0_40 = arith.constant 0 : index
    %c0_41 = arith.constant 0 : index
    %66 = vector.load %arg2[%c0_39, %c0_40, %c0_41] : memref<2x16x8xf32, #tpu.memory_space<vmem>>, vector<2x16x8xf32>
    %67 = arith.mulf %66, %66 : vector<2x16x8xf32>
    %cst_42 = arith.constant dense<0.000000e+00> : vector<2x16xf32>
    %68 = vector.multi_reduction <add>, %67, %cst_42 [2] : vector<2x16x8xf32> to vector<2x16xf32>
    %69 = vector.shape_cast %68 : vector<2x16xf32> to vector<2x16x1xf32>
    %70 = arith.mulf %65, %65 : vector<2x8x8xf32>
    %cst_43 = arith.constant dense<0.000000e+00> : vector<2x8xf32>
    %71 = vector.multi_reduction <add>, %70, %cst_43 [2] : vector<2x8x8xf32> to vector<2x8xf32>
    %72 = vector.shape_cast %71 : vector<2x8xf32> to vector<2x1x8xf32>
    "tpu.trace_start"() <{level = 10 : i32, message = "bpd,bnd->bpn"}> : () -> ()
    %cst_44 = arith.constant dense<0.000000e+00> : vector<2x16x8xf32>
    %73 = tpu.matmul %66, %65, %cst_44 {dimension_numbers = #tpu.dot_dimension_numbers<[2], [2], [1], [1], [0, 0, 0, 1, 1, 1], [0], [0]>} : vector<2x16x8xf32>, vector<2x8x8xf32>, vector<2x16x8xf32> -> vector<2x16x8xf32>
    "tpu.trace_stop"() : () -> ()
    %74 = vector.broadcast %69 : vector<2x16x1xf32> to vector<2x16x8xf32>
    %75 = vector.broadcast %72 : vector<2x1x8xf32> to vector<2x16x8xf32>
    %76 = arith.addf %74, %75 : vector<2x16x8xf32>
    %cst_45 = arith.constant 2.000000e+00 : f32
    %77 = vector.broadcast %cst_45 : f32 to vector<2x16x8xf32>
    %78 = arith.mulf %77, %73 : vector<2x16x8xf32>
    %79 = arith.subf %76, %78 : vector<2x16x8xf32>
    %cst_46 = arith.constant 0.000000e+00 : f32
    %80 = vector.broadcast %cst_46 : f32 to vector<2x16x8xf32>
    %81 = arith.subf %80, %79 : vector<2x16x8xf32>
    %c0_47 = arith.constant 0 : index
    %c0_48 = arith.constant 0 : index
    %82 = vector.load %arg10[%c0_47, %c0_48] : memref<1x8xf32, #tpu.memory_space<vmem>>, vector<1x8xf32>
    %83 = vector.shape_cast %82 : vector<1x8xf32> to vector<1x1x8xf32>
    %84 = vector.broadcast %83 : vector<1x1x8xf32> to vector<2x16x8xf32>
    %85 = arith.mulf %81, %84 : vector<2x16x8xf32>
    %cst_49 = arith.constant dense<0xFF800000> : vector<2x16xf32>
    %86 = vector.multi_reduction <maximumf>, %85, %cst_49 [2] : vector<2x16x8xf32> to vector<2x16xf32>
    %87 = vector.shape_cast %86 : vector<2x16xf32> to vector<2x16x1xf32>
    %88 = vector.broadcast %87 : vector<2x16x1xf32> to vector<2x16x8xf32>
    %89 = arith.subf %85, %88 : vector<2x16x8xf32>
    %90 = math.exp %89 : vector<2x16x8xf32>
    %cst_50 = arith.constant dense<0.000000e+00> : vector<2x16xf32>
    %91 = vector.multi_reduction <add>, %90, %cst_50 [2] : vector<2x16x8xf32> to vector<2x16xf32>
    %92 = vector.shape_cast %91 : vector<2x16xf32> to vector<2x16x1xf32>
    %93 = tpu.reciprocal %92 {approx = true} : vector<2x16x1xf32> -> vector<2x16x1xf32>
    %94 = vector.broadcast %93 : vector<2x16x1xf32> to vector<2x16x8xf32>
    %95 = arith.mulf %90, %94 : vector<2x16x8xf32>
    "tpu.trace_start"() <{level = 10 : i32, message = "bpn,bnd->bpd"}> : () -> ()
    %cst_51 = arith.constant dense<0.000000e+00> : vector<2x16x32xf32>
    %96 = tpu.matmul %95, %38, %cst_51 {dimension_numbers = #tpu.dot_dimension_numbers<[2], [1], [1], [2], [0, 0, 0, 1, 1, 2], [0], [0]>} : vector<2x16x8xf32>, vector<2x8x32xf32>, vector<2x16x32xf32> -> vector<2x16x32xf32>
    "tpu.trace_stop"() : () -> ()
    %97 = vector.shape_cast %96 : vector<2x16x32xf32> to vector<32x32xf32>
    %98 = vector.shape_cast %66 : vector<2x16x8xf32> to vector<32x8xf32>
    %c0_52 = arith.constant 0 : index
    %c0_53 = arith.constant 0 : index
    %99 = vector.load %arg12[%c0_52, %c0_53] : memref<32x64xf32, #tpu.memory_space<vmem>>, vector<32x64xf32>
    %cst_54 = arith.constant dense<0.000000e+00> : vector<32x64xf32>
    %100 = tpu.matmul %97, %99, %cst_54 {dimension_numbers = #tpu.dot_dimension_numbers<[1], [0], [0], [1], [0, 0, 1, 1], [], []>} : vector<32x32xf32>, vector<32x64xf32>, vector<32x64xf32> -> vector<32x64xf32>
    %c0_55 = arith.constant 0 : index
    %c0_56 = arith.constant 0 : index
    %101 = vector.load %arg11[%c0_55, %c0_56] : memref<8x64xf32, #tpu.memory_space<vmem>>, vector<8x64xf32>
    %cst_57 = arith.constant dense<0.000000e+00> : vector<32x64xf32>
    %102 = tpu.matmul %98, %101, %cst_57 {dimension_numbers = #tpu.dot_dimension_numbers<[1], [0], [0], [1], [0, 0, 1, 1], [], []>} : vector<32x8xf32>, vector<8x64xf32>, vector<32x64xf32> -> vector<32x64xf32>
    %103 = arith.addf %100, %102 : vector<32x64xf32>
    %c0_58 = arith.constant 0 : index
    %c0_59 = arith.constant 0 : index
    %104 = vector.load %arg13[%c0_58, %c0_59] : memref<1x64xf32, #tpu.memory_space<vmem>>, vector<1x64xf32>
    %105 = vector.broadcast %104 : vector<1x64xf32> to vector<32x64xf32>
    %106 = arith.addf %103, %105 : vector<32x64xf32>
    %cst_60 = arith.constant 0.000000e+00 : f32
    %107 = vector.broadcast %cst_60 : f32 to vector<32x64xf32>
    %108 = arith.maximumf %106, %107 : vector<32x64xf32>
    %c0_61 = arith.constant 0 : index
    %c0_62 = arith.constant 0 : index
    %109 = vector.load %arg14[%c0_61, %c0_62] : memref<1x64xf32, #tpu.memory_space<vmem>>, vector<1x64xf32>
    %110 = vector.broadcast %109 : vector<1x64xf32> to vector<32x64xf32>
    %111 = arith.mulf %108, %110 : vector<32x64xf32>
    %cst_63 = arith.constant dense<0.000000e+00> : vector<32xf32>
    %112 = vector.multi_reduction <add>, %111, %cst_63 [1] : vector<32x64xf32> to vector<32xf32>
    %113 = vector.shape_cast %112 : vector<32xf32> to vector<1x32xf32>
    %c0_64 = arith.constant 0 : index
    %c0_65 = arith.constant 0 : index
    %114 = vector.load %arg15[%c0_64, %c0_65] : memref<1x1xf32, #tpu.memory_space<vmem>>, vector<1x1xf32>
    %115 = vector.broadcast %114 : vector<1x1xf32> to vector<1x32xf32>
    %116 = arith.addf %113, %115 : vector<1x32xf32>
    %c0_66 = arith.constant 0 : index
    %c0_67 = arith.constant 0 : index
    %c0_68 = arith.constant 0 : index
    %117 = vector.load %arg19[%c0_66, %c0_67, %c0_68] : memref<1x1x32xf32, #tpu.memory_space<vmem>>, vector<1x1x32xf32>
    %118 = vector.shape_cast %117 : vector<1x1x32xf32> to vector<1x32xf32>
    %119 = vector.shape_cast %116 : vector<1x32xf32> to vector<1x1x32xf32>
    tpu.vector_store %arg19[%c0_66, %c0_67, %c0_68], %119 {strides = array<i32>} : memref<1x1x32xf32, #tpu.memory_space<vmem>>, vector<1x1x32xf32>,
    return
  }
  func.func @transform_0(%arg0: i32) -> (i32, i32, i32) {
    %c0_i32 = arith.constant 0 : i32
    %c0_i32_0 = arith.constant 0 : i32
    %c0_i32_1 = arith.constant 0 : i32
    return %arg0, %c0_i32, %c0_i32_0 : i32, i32, i32
  }
  func.func @transform_1(%arg0: i32) -> (i32, i32, i32) {
    %c0_i32 = arith.constant 0 : i32
    %c0_i32_0 = arith.constant 0 : i32
    %c0_i32_1 = arith.constant 0 : i32
    return %arg0, %c0_i32, %c0_i32_0 : i32, i32, i32
  }
  func.func @transform_2(%arg0: i32) -> (i32, i32) {
    %c0_i32 = arith.constant 0 : i32
    %c0_i32_0 = arith.constant 0 : i32
    %c0_i32_1 = arith.constant 0 : i32
    return %c0_i32, %c0_i32_0 : i32, i32
  }
  func.func @transform_3(%arg0: i32) -> (i32, i32) {
    %c0_i32 = arith.constant 0 : i32
    %c0_i32_0 = arith.constant 0 : i32
    %c0_i32_1 = arith.constant 0 : i32
    return %c0_i32, %c0_i32_0 : i32, i32
  }
  func.func @transform_4(%arg0: i32) -> (i32, i32) {
    %c0_i32 = arith.constant 0 : i32
    %c0_i32_0 = arith.constant 0 : i32
    %c0_i32_1 = arith.constant 0 : i32
    return %c0_i32, %c0_i32_0 : i32, i32
  }
  func.func @transform_5(%arg0: i32) -> (i32, i32) {
    %c0_i32 = arith.constant 0 : i32
    %c0_i32_0 = arith.constant 0 : i32
    %c0_i32_1 = arith.constant 0 : i32
    return %c0_i32, %c0_i32_0 : i32, i32
  }
  func.func @transform_6(%arg0: i32) -> (i32, i32) {
    %c0_i32 = arith.constant 0 : i32
    %c0_i32_0 = arith.constant 0 : i32
    %c0_i32_1 = arith.constant 0 : i32
    return %c0_i32, %c0_i32_0 : i32, i32
  }
  func.func @transform_7(%arg0: i32) -> (i32, i32) {
    %c0_i32 = arith.constant 0 : i32
    %c0_i32_0 = arith.constant 0 : i32
    %c0_i32_1 = arith.constant 0 : i32
    return %c0_i32, %c0_i32_0 : i32, i32
  }
  func.func @transform_8(%arg0: i32) -> (i32, i32) {
    %c0_i32 = arith.constant 0 : i32
    %c0_i32_0 = arith.constant 0 : i32
    %c0_i32_1 = arith.constant 0 : i32
    return %c0_i32, %c0_i32_0 : i32, i32
  }
  func.func @transform_9(%arg0: i32) -> (i32, i32) {
    %c0_i32 = arith.constant 0 : i32
    %c0_i32_0 = arith.constant 0 : i32
    %c0_i32_1 = arith.constant 0 : i32
    return %c0_i32, %c0_i32_0 : i32, i32
  }
  func.func @transform_10(%arg0: i32) -> (i32, i32) {
    %c0_i32 = arith.constant 0 : i32
    %c0_i32_0 = arith.constant 0 : i32
    %c0_i32_1 = arith.constant 0 : i32
    return %c0_i32, %c0_i32_0 : i32, i32
  }
  func.func @transform_11(%arg0: i32) -> (i32, i32) {
    %c0_i32 = arith.constant 0 : i32
    %c0_i32_0 = arith.constant 0 : i32
    %c0_i32_1 = arith.constant 0 : i32
    return %c0_i32, %c0_i32_0 : i32, i32
  }
  func.func @transform_12(%arg0: i32) -> (i32, i32) {
    %c0_i32 = arith.constant 0 : i32
    %c0_i32_0 = arith.constant 0 : i32
    %c0_i32_1 = arith.constant 0 : i32
    return %c0_i32, %c0_i32_0 : i32, i32
  }
  func.func @transform_13(%arg0: i32) -> (i32, i32) {
    %c0_i32 = arith.constant 0 : i32
    %c0_i32_0 = arith.constant 0 : i32
    %c0_i32_1 = arith.constant 0 : i32
    return %c0_i32, %c0_i32_0 : i32, i32
  }
  func.func @transform_14(%arg0: i32) -> (i32, i32) {
    %c0_i32 = arith.constant 0 : i32
    %c0_i32_0 = arith.constant 0 : i32
    %c0_i32_1 = arith.constant 0 : i32
    return %c0_i32, %c0_i32_0 : i32, i32
  }
  func.func @transform_15(%arg0: i32) -> (i32, i32, i32) {
    %c0_i32 = arith.constant 0 : i32
    %c0_i32_0 = arith.constant 0 : i32
    %c0_i32_1 = arith.constant 0 : i32
    return %arg0, %c0_i32, %c0_i32_0 : i32, i32, i32
  }
  func.func @transform_16(%arg0: i32) -> (i32, i32, i32) {
    %c0_i32 = arith.constant 0 : i32
    %c0_i32_0 = arith.constant 0 : i32
    %c0_i32_1 = arith.constant 0 : i32
    return %arg0, %c0_i32, %c0_i32_0 : i32, i32, i32
  }
  func.func @transform_17(%arg0: i32) -> (i32, i32, i32) {
    %c0_i32 = arith.constant 0 : i32
    %c0_i32_0 = arith.constant 0 : i32
    %c0_i32_1 = arith.constant 0 : i32
    return %arg0, %c0_i32, %c0_i32_0 : i32, i32, i32
  }
  func.func @transform_18(%arg0: i32) -> (i32, i32, i32) {
    %c0_i32 = arith.constant 0 : i32
    %c0_i32_0 = arith.constant 0 : i32
    %c0_i32_1 = arith.constant 0 : i32
    return %arg0, %c0_i32, %c0_i32_0 : i32, i32, i32
  }
}

</mosaic_0001>

<bundles_post_ra>
// kernel: autoencoder_forward.1
= control target key start
LH: loop header
LB: loop body
LE: loop exit
PB: predicated region body
PF: predicated region fallthrough
CT: control target
= control target key end

     0   :  { %vm66_vm0 = vcmask 64512   ;;  %vm165_vm1 = vcmask 523264   ;;  %vm247_vm2 = vcmask 261120   ;;  %v346_v42 = vlaneseq  ;;  %s1871_s2 = inlined_call_operand.vmem [shape: f32[8,64], index: 2, kind: input, shape index: {}]   ;;  %s1872_s0 = inlined_call_operand.vmem [shape: f32[2,8,8], index: 0, kind: input, shape index: {}]   ;;  %s1873_s4 = inlined_call_operand.vmem [shape: f32[64,32], index: 4, kind: input, shape index: {}]   ;;  %s1874_s7 = inlined_call_operand.vmem [shape: f32[32,64], index: 7, kind: input, shape index: {}]   ;;  %s1875_s3 = inlined_call_operand.vmem [shape: f32[1,64], index: 3, kind: input, shape index: {}]   ;;  %s1876_s5 = inlined_call_operand.vmem [shape: f32[1,32], index: 5, kind: input, shape index: {}]   ;;  %s1877_s15 = inlined_call_operand.vmem [shape: f32[2,8,32], index: 15, kind: output, shape index: {0}]   ;;  %s1878_s8 = inlined_call_operand.vmem [shape: f32[1,64], index: 8, kind: input, shape index: {}]   ;;  %s1879_s6 = inlined_call_operand.vmem [shape: f32[64,32], index: 6, kind: input, shape index: {}]   ;;  %s1880_s1 = inlined_call_operand.vmem [shape: f32[2,16,8], index: 1, kind: input, shape index: {}]   ;;  %s1881_s17 = inlined_call_operand.vmem [shape: f32[1,1,64], index: 17, kind: output, shape index: {2}]   ;;  %s1882_s16 = inlined_call_operand.vmem [shape: f32[2,8,32], index: 16, kind: output, shape index: {1}]   ;;  %s1883_s9 = inlined_call_operand.vmem [shape: f32[1,8], index: 9, kind: input, shape index: {}]   ;;  %s1884_s10 = inlined_call_operand.vmem [shape: f32[8,64], index: 10, kind: input, shape index: {}]   ;;  %s1885_s11 = inlined_call_operand.vmem [shape: f32[32,64], index: 11, kind: input, shape index: {}]   ;;  %s1886_s14 = inlined_call_operand.<no memory space> [shape: f32[1,1], index: 14, kind: input, shape index: {}]   ;;  %s1887_s12 = inlined_call_operand.vmem [shape: f32[1,64], index: 12, kind: input, shape index: {}]   ;;  %s1888_s13 = inlined_call_operand.vmem [shape: f32[1,64], index: 13, kind: input, shape index: {}]   ;;  %s1889_s18 = inlined_call_operand.vmem [shape: f32[1,1,32], index: 18, kind: output, shape index: {3}]  }
   0x1   :  { %1892 = sst [smem:[#allocation3_spill]] %s1871_s2  ;;  %v251_v15 = vld [vmem:[%s1874_s7] sm:$0xff]  ;;  %v252_v16 = vld [vmem:[%s1874_s7 + $0x8] sm:$0xff]  ;;  %v253_v25 = vld [vmem:[%s1874_s7 + $0x10] sm:$0xff]  ;;  %vm494_vm10 = vcmask 516096   ;;  %vm1229_vm11 = vcmask 130112  }
   0x2   :  { %1893 = sst [smem:[#allocation4_spill]] %s1872_s0  ;;  %s1895_s29 = sld [smem:[#allocation3_spill]]  ;;  %v1467_v17 = vpack.c.bf16 %v252_v16, %v251_v15  ;;  %v1264_v18 = vld [vmem:[%s1875_s3] ss:$0 sm:$0xff]  ;;  %v254_v26 = vld [vmem:[%s1874_s7 + $0x18] sm:$0xff]  ;;  %v1700_v43 = vand.u32 127, %v346_v42 }
   0x3   :  { %1894 = sst [smem:[#allocation5_spill]] %s1873_s4  ;;  %s1896_s19 = sld [smem:[#allocation4_spill]]  ;;  %v1471_v27 = vpack.c.bf16 %v254_v26, %v253_v25  ;;  %v1267_v28 = vld [vmem:[%s1876_s5] ss:$0 sm:$0xff]  ;;  %v395_v55 = vld [vmem:[%s1879_s6 + $0x8] sm:$0xff]  ;;  %v396_v56 = vld [vmem:[%s1879_s6 + $0x10] sm:$0xff] }
   0x4   :  { %s1897_s4 = sld [smem:[#allocation5_spill]]  ;;  %v1272_v35 = vld [vmem:[%s1878_s8] ss:$0 sm:$0xff]  ;;  %v397_v58 = vld [vmem:[%s1879_s6 + $0x18] sm:$0xff]  ;;  %v399_v61 = vld [vmem:[%s1879_s6 + $0x28] sm:$0xff]  ;;  %vm504_vm7 = vcmp.lt.s32.totalorder %v1700_v43, 3 }
   0x5   :  { %v394_v54 = vld [vmem:[%s1879_s6] sm:$0xff]  ;;  %v1479_v59 = vpack.c.bf16 %v397_v58, %v396_v56  ;;  %v1526_v25 = vmov 0.0   ;;  %vm1236_vm12 = vcmask 195712   ;;  %vm1243_vm13 = vcmask 261312  }
   0x6   :  { %v1475_v57 = vpack.c.bf16 %v395_v55, %v394_v54  ;;  %v398_v60 = vld [vmem:[%s1879_s6 + $0x20] sm:$0xff]  ;;  %v1277_v26 = vsel %vm504_vm7, 1.0, %v1526_v25  ;;  %vm1246_vm14 = vcmask 253952  }
   0x7   :  { %v1483_v62 = vpack.c.bf16 %v399_v61, %v398_v60 }
   0x8   :  { %v58_v0 = vld [vmem:[%s1895_s29] sm:$0xff] }
   0x9   :  { %v1629_v1 = vld [vmem:[%s1896_s19] sm:$0xff]  ;;  %v1634_v2 = vld [vmem:[%s1896_s19 + $0x8] sm:$0xff]  ;;  %1355 = vmatprep.subr.mxu0 %v58_v0 }
   0xa   :  { %1357 = vmatprep.mubr.msk.f32.mxu0 %vm66_vm0, %v1629_v1  ;;  %v150_v3 = vld [vmem:[%s1897_s4] sm:$0xff]  ;;  %v151_v4 = vld [vmem:[%s1897_s4 + $0x8] sm:$0xff]  ;;  %v152_v5 = vld [vmem:[%s1897_s4 + $0x10] sm:$0xff]  ;;  %1356 = vmatpush3.msra.mxu0 %v58_v0  ;;  %v496_v63 = vadd.f32 1.0, %v1629_v1 }
   0xb   :  { %v1451_v6 = vpack.c.bf16 %v151_v4, %v150_v3  ;;  %v153_v7 = vld [vmem:[%s1897_s4 + $0x18] sm:$0xff]  ;;  %1358 = vmatmul.mubr.msk.f32.vlgmr.msra.gmra.mrb[0].mxu0 %vm66_vm0, %v1634_v2  ;;  %v154_v9 = vld [vmem:[%s1897_s4 + $0x20] sm:$0xff]  ;;  %v155_v10 = vld [vmem:[%s1897_s4 + $0x28] sm:$0xff]  ;;  %1468 = vmatprep.subr.bf16.mxu0 %v1467_v17 }
   0xc   :  { %v1455_v8 = vpack.c.bf16 %v153_v7, %v152_v5  ;;  %v1459_v11 = vpack.c.bf16 %v155_v10, %v154_v9  ;;  %v156_v12 = vld [vmem:[%s1897_s4 + $0x30] sm:$0xff]  ;;  %v157_v13 = vld [vmem:[%s1897_s4 + $0x38] sm:$0xff]  ;;  %1470 = vmatpush3.bf16.msra.mxu0 %v1467_v17  ;;  %v498_v0 = vmul.f32 0.5, %v496_v63  ;;  %v497_v10 = vadd.f32 1.0, %v1634_v2 }
   0xd   :  { %1452 = vmatprep.subr.bf16.mxu1 %v1451_v6  ;;  %v1463_v14 = vpack.c.bf16 %v157_v13, %v156_v12  ;;  %1472 = vmatprep.subr.bf16.mxu0 %v1471_v27 }
   0xe   :  { %1454 = vmatpush3.bf16.msra.mxu1 %v1451_v6  ;;  %v500_v4 = vmul.f32 255.0, %v498_v0  ;;  %v499_v15 = vmul.f32 0.5, %v497_v10 }
   0xf   :  { %1456 = vmatprep.subr.bf16.mxu1 %v1455_v8 }
  0x10   :  { %1474 = vmatpush3.bf16.msra.mxu0 %v1471_v27  ;;  %v501_v16 = vmul.f32 255.0, %v499_v15 }
  0x11   :  { %1476 = vmatprep.subr.bf16.mxu0 %v1475_v57 }
  0x12   :  { %1458 = vmatpush3.bf16.msra.mxu1 %v1455_v8  ;;  %v1503_v8 = vtrunc.f32 %v500_v4 }
  0x13   :  { %1460 = vmatprep.subr.bf16.mxu1 %v1459_v11 }
  0x14   :  { %v1504_v13 = vcvt.f32.s32 %v1503_v8 }
  0x16   :  { %1462 = vmatpush3.bf16.msra.mxu1 %v1459_v11  ;;  %v507_v1 = vcvt.s32.f32 %v1504_v13 }
  0x17   :  { %1464 = vmatprep.subr.bf16.mxu1 %v1463_v14 }
  0x18   :  { %v510_v17 = vmul.f32 0.003921569, %v507_v1 }
  0x1a   :  { %1466 = vmatpush3.bf16.msra.mxu1 %v1463_v14 }
  0xde   :  { %v1359_v19 = vpop.f32.mrb[0].mxu0 }
  0xdf   :  { %v145_v20 = vadd.f32 %v1359_v19, %v1264_v18  ;;  %v139_v21 = vpop.f32.mrb[1].mxu0  ;;  %v401_v19 = vld [vmem:[%s1879_s6 + $0x38] sm:$0xff] }
  0xe0   :  { %v140_v22 = vadd.f32 %v1264_v18, %v139_v21  ;;  %v400_v18 = vld [vmem:[%s1879_s6 + $0x30] sm:$0xff]  ;;  %v512_v21 = vmul.f32 2.0, %v510_v17 }
  0xe1   :  { %v149_v24 = vmax.f32 %v145_v20, 0.0  ;;  %v1505_v20 = vtrunc.f32 %v501_v16  ;;  %v1487_v2 = vpack.c.bf16 %v401_v19, %v400_v18 }
  0xe2   :  { %v148_v23 = vmax.f32 %v140_v22, 0.0 }
  0xe3   :  { %v1506_v22 = vcvt.f32.s32 %v1505_v20 }
  0xe4   :  { %1376 = vmatprep.mubr.msk.f32.mxu1 %vm165_vm1, %v148_v23  ;;  %v1278_v23 = vadd.f32 -1.0, %v512_v21 }
  0xe5   :  { %1377 = vmatmul.mubr.msk.f32.vlgmr.msra.gmra.mrb[0].mxu1 %vm165_vm1, %v149_v24  ;;  %v508_v24 = vcvt.s32.f32 %v1506_v22 }
  0xe6   :  { %v516_v27 = vmul.f32 %v1278_v23, %v1277_v26 }
 0x1b8   :  { %v1378_v29 = vpop.f32.mrb[0].mxu1 }
 0x1b9   :  { %v244_v30 = vadd.f32 %v1378_v29, %v1267_v28  ;;  %v238_v31 = vpop.f32.mrb[1].mxu1 }
 0x1ba   :  { %v239_v32 = vadd.f32 %v1267_v28, %v238_v31  ;;  %v511_v28 = vmul.f32 0.003921569, %v508_v24 }
 0x1bb   :  { %249 = vst.msk [vmem:[%s1877_s15 + $0x8] sm:$0xff] %vm247_vm2, %v244_v30 }
 0x1bc   :  { %248 = vst.msk [vmem:[%s1877_s15] sm:$0xff] %vm247_vm2, %v239_v32  ;;  %1387 = vmatprep.mubr.msk.f32.mxu0 %vm247_vm2, %v239_v32  ;;  %v513_v29 = vmul.f32 2.0, %v511_v28  ;;  %v1737_v32 = vld [vmem:[%s1880_s1] sm:$0xff] }
 0x1bd   :  { %1388 = vmatmul.mubr.msk.f32.vlgmr.msra.gmra.mrb[2].mxu0 %vm247_vm2, %v244_v30 }
 0x1be   :  { %1478 = vmatpush3.bf16.msra.mxu0 %v1475_v57  ;;  %v1279_v30 = vadd.f32 -1.0, %v513_v29  ;;  %v1286_v29 = vld [vmem:[%s1883_s9] ss:$0 sm:$0xff] }
 0x1bf   :  { %1480 = vmatprep.subr.bf16.mxu0 %v1479_v59 }
 0x1c0   :  { %v517_v31 = vmul.f32 %v1279_v30, %v1277_v26 }
 0x1c2   :  { %1482 = vmatpush3.bf16.msra.mxu0 %v1479_v59 }
 0x1c3   :  { %1484 = vmatprep.subr.bf16.mxu0 %v1483_v62 }
 0x1c6   :  { %1486 = vmatpush3.bf16.msra.mxu0 %v1483_v62 }
 0x1c7   :  { %1488 = vmatprep.subr.bf16.mxu0 %v1487_v2 }
 0x1ca   :  { %1490 = vmatpush3.bf16.msra.mxu0 %v1487_v2 }
 0x1cb   :  { %1409 = vmatprep.subr.msk.mxu0 %vm66_vm0, %v516_v27 }
 0x290   :  { %v1389_v33 = vpop.f32.mrb[2].mxu0 }
 0x291   :  { %v327_v34 = vpop.f32.mrb[3].mxu0  ;;  %v337_v36 = vmul.f32 2.0, %v1389_v33  ;;  %v1742_v33 = vld [vmem:[%s1880_s1 + $0x8] sm:$0xff] }
 0x292   :  { %v336_v37 = vmul.f32 2.0, %v327_v34  ;;  %v538_v34 = vmul.f32 %v516_v27, %v516_v27 }
 0x293   :  { %v345_v40 = vsub.f32 %v1272_v35, %v337_v36  ;;  %v523_v36 = vmul.f32 %v1742_v33, %v1742_v33 }
 0x294   :  { %v344_v38 = vsub.f32 %v1272_v35, %v336_v37  ;;  %v522_v35 = vmul.f32 %v1737_v32, %v1737_v32  ;;  %v539_v37 = vmul.f32 %v517_v31, %v517_v31 }
 0x295   :  { %v351_v41 = vsel %vm165_vm1, %v345_v40, inf }
 0x296   :  { %v348_v39 = vsel %vm165_vm1, %v344_v38, inf }
 0x297   :  { %349 = vmin.xlane.f32.xlu0 %v348_v39  ;;  %v526_v39 = vsel %vm66_vm0, %v522_v35, 0.0 }
 0x29b   :  { %352 = vmin.xlane.f32.xlu0 %v351_v41  ;;  %v1758_v41 = vld [vmem:[%s1880_s1 + $0x18] sm:$0xff] }
 0x324   :  { %v350_v44 = vpop.xlane.xlu0 %349 }
 0x325   :  { %vm354_vm3 = vcmp.le.f32.partialorder %v344_v38, %v350_v44  ;;  %v540_v38 = vsel %vm66_vm0, %v538_v34, 0.0  ;;  %v529_v44 = vsel %vm66_vm0, %v523_v36, 0.0 }
 0x326   :  { %v356_v45 = vsel %vm354_vm3, %v1700_v43, 64 }
 0x327   :  { %v358_v46 = vsel %vm165_vm1, %v356_v45, 2147483647  ;;  %v543_v45 = vsel %vm66_vm0, %v539_v37, 0.0 }
 0x328   :  { %v353_v47 = vpop.xlane.xlu0 %352  ;;  %v360_v48 = vshra.s32 %v358_v46, 16  ;;  %v359_v3 = vand.u32 65535, %v358_v46 }
 0x329   :  { %vm355_vm4 = vcmp.le.f32.partialorder %v345_v40, %v353_v47  ;;  %v1753_v40 = vld [vmem:[%s1880_s1 + $0x10] sm:$0xff]  ;;  %v525_v47 = vmul.f32 %v1758_v41, %v1758_v41 }
 0x32a   :  { %v357_v49 = vsel %vm355_vm4, %v1700_v43, 64  ;;  %v362_v50 = vcvt.s32.f32 %v360_v48  ;;  %v361_v6 = vcvt.s32.f32 %v359_v3  ;;  %v524_v46 = vmul.f32 %v1753_v40, %v1753_v40 }
 0x32b   :  { %v373_v51 = vsel %vm165_vm1, %v357_v49, 2147483647  ;;  %v535_v49 = vsel %vm66_vm0, %v525_v47, 0.0 }
 0x32c   :  { %363 = vmin.xlane.f32.xlu1 %v362_v50  ;;  %v375_v52 = vshra.s32 %v373_v51, 16  ;;  %v374_v7 = vand.u32 65535, %v373_v51  ;;  %v532_v48 = vsel %vm66_vm0, %v524_v46, 0.0 }
 0x32e   :  { %v377_v53 = vcvt.s32.f32 %v375_v52  ;;  %v376_v12 = vcvt.s32.f32 %v374_v7 }
 0x330   :  { %378 = vmin.xlane.f32.xlu1 %v377_v53 }
 0x3b9   :  { %v364_v5 = vpop.xlane.xlu1 %363 }
 0x3ba   :  { %vm365_vm5 = vcmp.eq.f32.partialorder %v362_v50, %v364_v5  ;;  %v370_v50 = vcvt.f32.s32 %v364_v5 }
 0x3bb   :  { %v366_v9 = vsel %vm365_vm5, %v361_v6, inf }
 0x3bc   :  { %367 = vmin.xlane.f32.xlu0 %v366_v9  ;;  %v371_v52 = vshll.u32 %v370_v50, 16  ;;  %v1789_v9 = vshrl.u32 %v346_v42, 7 }
 0x3bd   :  { %v379_v11 = vpop.xlane.xlu1 %378 }
 0x3be   :  { %vm380_vm6 = vcmp.eq.f32.partialorder %v377_v53, %v379_v11  ;;  %v385_v53 = vcvt.f32.s32 %v379_v11 }
 0x3bf   :  { %v381_v14 = vsel %vm380_vm6, %v376_v12, inf  ;;  %v1793_v12 = vsub.s32 %v1700_v43, %v1789_v9 }
 0x3c0   :  { %382 = vmin.xlane.f32.xlu1 %v381_v14  ;;  %541 = vadd.xlane.f32.xlu0 %v540_v38  ;;  %v386_v57 = vshll.u32 %v385_v53, 16 }
 0x3c4   :  { %527 = vadd.xlane.f32.xlu1 %v526_v39  ;;  %530 = vadd.xlane.f32.xlu0 %v529_v44 }
 0x3c8   :  { %544 = vadd.xlane.f32.xlu1 %v543_v45  ;;  %533 = vadd.xlane.f32.xlu0 %v532_v48 }
 0x3cc   :  { %536 = vadd.xlane.f32.xlu1 %v535_v49 }
 0x449   :  { %v368_v51 = vpop.xlane.xlu0 %367 }
 0x44a   :  { %v369_v54 = vcvt.f32.s32 %v368_v51 }
 0x44c   :  { %v372_v55 = vadd.s32 %v371_v52, %v369_v54 }
 0x44d   :  { %v383_v56 = vpop.xlane.xlu1 %382  ;;  %v542_v11 = vpop.xlane.xlu0 %541 }
 0x44e   :  { %v384_v58 = vcvt.f32.s32 %v383_v56  ;;  %vm388_vm8 = vcmp.eq.s32.totalorder %v1700_v43, %v372_v55  ;;  %v719_v14 = vrot.slane %v542_v11, %v1793_v12 }
 0x44f   :  { %v1273_v59 = vsel %vm388_vm8, 1.0, %v1526_v25 }
 0x450   :  { %v387_v60 = vadd.s32 %v386_v57, %v384_v58  ;;  %1406 = vmatprep.mubr.msk.f32.mxu0 %vm165_vm1, %v1273_v59  ;;  %v485_v62 = vsel %vm165_vm1, %v1273_v59, 0.0 }
 0x451   :  { %v528_v10 = vpop.xlane.xlu1 %527  ;;  %v531_v15 = vpop.xlane.xlu0 %530 }
 0x452   :  { %vm389_vm9 = vcmp.eq.s32.totalorder %v1700_v43, %v387_v60  ;;  %v745_v42 = vadd.f32 %v719_v14, %v531_v15  ;;  %v744_v22 = vadd.f32 %v719_v14, %v528_v10 }
 0x453   :  { %v1274_v61 = vsel %vm389_vm9, 1.0, %v1526_v25 }
 0x454   :  { %v486_v63 = vsel %vm165_vm1, %v1274_v61, 0.0  ;;  %1407 = vmatmul.mubr.msk.f32.vlgmr.msra.gmra.mrb[4].mxu0 %vm165_vm1, %v1274_v61 }
 0x455   :  { %v487_v0 = vadd.f32 %v486_v63, %v485_v62  ;;  %1410 = vmatpush3.xpose.msk.msra.mxu0 %vm66_vm0, %v516_v27  ;;  %1411 = vmatprep.mubr.msk.f32.mxu0 %vm66_vm0, %v1737_v32  ;;  %v545_v13 = vpop.xlane.xlu1 %544  ;;  %v534_v21 = vpop.xlane.xlu0 %533 }
 0x456   :  { %1414 = vmatprep.subr.msk.mxu0 %vm66_vm0, %v517_v31  ;;  %v723_v17 = vrot.slane %v545_v13, %v1793_v12  ;;  %v981_v13 = vld [vmem:[%s1884_s10] sm:$0xff] }
 0x457   :  { %v488_v3 = vrot.slane %v487_v0, 4 }
 0x458   :  { %1412 = vmatmul.mubr.msk.f32.vlgmr.msra.gmra.mrb[6].mxu0 %vm66_vm0, %v1742_v33  ;;  %v746_v28 = vadd.f32 %v723_v17, %v534_v21 }
 0x459   :  { %v489_v4 = vadd.f32 %v488_v3, %v487_v0  ;;  %1415 = vmatpush3.xpose.msk.msra.mxu0 %vm66_vm0, %v517_v31  ;;  %1416 = vmatprep.mubr.msk.f32.mxu0 %vm66_vm0, %v1753_v40  ;;  %v537_v19 = vpop.xlane.xlu1 %536 }
 0x45a   :  { %v747_v25 = vadd.f32 %v723_v17, %v537_v19  ;;  %v977_v17 = vld [vmem:[%s1885_s11] sm:$0xff] }
 0x45b   :  { %v490_v5 = vrot.slane %v489_v4, 2 }
 0x45c   :  { %1417 = vmatmul.mubr.msk.f32.vlgmr.msra.gmra.mrb[8].mxu0 %vm66_vm0, %v1758_v41 }
 0x45d   :  { %v491_v6 = vadd.f32 %v490_v5, %v489_v4 }
 0x45f   :  { %v492_v7 = vrot.slane %v491_v6, 1 }
 0x461   :  { %v493_v8 = vadd.f32 %v492_v7, %v491_v6 }
 0x463   :  { %495 = vst.msk [vmem:[%s1881_s17] sm:$0x1] %vm494_vm10, %v493_v8 }
 0x527   :  { %v1408_v1 = vpop.f32.mrb[4].mxu0 }
 0x528   :  { %484 = vst.msk [vmem:[%s1882_s16 + $0x8] sm:$0xff] %vm247_vm2, %v1408_v1  ;;  %v474_v16 = vpop.f32.mrb[5].mxu0  ;;  %1424 = vmatprep.subr.mxu0 %v1408_v1 }
 0x529   :  { %483 = vst.msk [vmem:[%s1882_s16] sm:$0xff] %vm247_vm2, %v474_v16  ;;  %1419 = vmatprep.subr.mxu1 %v474_v16  ;;  %1425 = vmatpush3.msra.mxu0 %v1408_v1 }
 0x52a   :  { %1420 = vmatpush3.msra.mxu1 %v474_v16 }
 0x52b   :  { %v1413_v18 = vpop.f32.mrb[6].mxu0  ;;  %1429 = vmatprep.subr.mxu1 %v981_v13 }
 0x52c   :  { %v749_v20 = vmul.f32 2.0, %v1413_v18  ;;  %v621_v2 = vpop.f32.mrb[7].mxu0  ;;  %v978_v18 = vld [vmem:[%s1885_s11 + $0x8] sm:$0xff] }
 0x52d   :  { %v748_v23 = vmul.f32 2.0, %v621_v2  ;;  %v1491_v21 = vpack.c.bf16 %v978_v18, %v977_v17 }
 0x52e   :  { %v753_v24 = vsub.f32 %v745_v42, %v749_v20 }
 0x52f   :  { %v752_v26 = vsub.f32 %v744_v22, %v748_v23  ;;  %v1418_v27 = vpop.f32.mrb[8].mxu0  ;;  %v979_v23 = vld [vmem:[%s1885_s11 + $0x10] sm:$0xff] }
 0x530   :  { %v757_v30 = vsub.f32 0.0, %v753_v24  ;;  %v751_v31 = vmul.f32 2.0, %v1418_v27  ;;  %v705_v34 = vpop.f32.mrb[9].mxu0  ;;  %v980_v24 = vld [vmem:[%s1885_s11 + $0x18] sm:$0xff] }
 0x531   :  { %v756_v35 = vsub.f32 0.0, %v752_v26  ;;  %v750_v36 = vmul.f32 2.0, %v705_v34 }
 0x532   :  { %v755_v37 = vsub.f32 %v747_v25, %v751_v31  ;;  %v768_v38 = vmul.f32 %v1286_v29, %v757_v30 }
 0x533   :  { %v754_v39 = vsub.f32 %v746_v28, %v750_v36  ;;  %v767_v44 = vmul.f32 %v1286_v29, %v756_v35  ;;  %v1495_v28 = vpack.c.bf16 %v980_v24, %v979_v23 }
 0x534   :  { %v759_v45 = vsub.f32 0.0, %v755_v37  ;;  %v774_v46 = vsel %vm66_vm0, %v768_v38, -inf }
 0x535   :  { %v758_v47 = vsub.f32 0.0, %v754_v39  ;;  %775 = vmax.xlane.f32.xlu1 %v774_v46  ;;  %v771_v48 = vsel %vm66_vm0, %v767_v44, -inf }
 0x536   :  { %772 = vmax.xlane.f32.xlu0 %v771_v48  ;;  %v770_v49 = vmul.f32 %v1286_v29, %v759_v45 }
 0x537   :  { %v769_v50 = vmul.f32 %v1286_v29, %v758_v47 }
 0x538   :  { %v780_v51 = vsel %vm66_vm0, %v770_v49, -inf }
 0x539   :  { %781 = vmax.xlane.f32.xlu1 %v780_v51  ;;  %v777_v52 = vsel %vm66_vm0, %v769_v50, -inf }
 0x53a   :  { %778 = vmax.xlane.f32.xlu0 %v777_v52 }
 0x5c2   :  { %v776_v53 = vpop.xlane.xlu1 %775 }
 0x5c3   :  { %v784_v54 = vsub.f32 %v768_v38, %v776_v53  ;;  %v773_v55 = vpop.xlane.xlu0 %772  ;;  %v1300_v38 = vld [vmem:[%s1888_s13] ss:$0 sm:$0xff] }
 0x5c4   :  { %v783_v56 = vsub.f32 %v767_v44, %v773_v55 }
 0x5c5   :  { %v789_v57 = vmul.f32 1.442695, %v784_v54 }
 0x5c6   :  { %v787_v58 = vmul.f32 1.442695, %v783_v56  ;;  %v782_v59 = vpop.xlane.xlu1 %781 }
 0x5c7   :  { %1510 = vpow2.f32 %v789_v57  ;;  %v786_v60 = vsub.f32 %v770_v49, %v782_v59  ;;  %v779_v61 = vpop.xlane.xlu0 %778 }
 0x5c8   :  { %1512 = vpow2.f32 %v787_v58  ;;  %v785_v62 = vsub.f32 %v769_v50, %v779_v61 }
 0x5c9   :  { %v793_v63 = vmul.f32 1.442695, %v786_v60 }
 0x5ca   :  { %v791_v0 = vmul.f32 1.442695, %v785_v62 }
 0x5cb   :  { %1514 = vpow2.f32 %v793_v63  ;;  %v1210_v63 = vsub.s32 0, %v1789_v9 }
 0x5cc   :  { %1516 = vpow2.f32 %v791_v0  ;;  %v1224_v0 = vadd.s32 4294967288, %v1700_v43 }
 0x5d1   :  { %v1511_v3 = vpop.eup %1510 }
 0x5d2   :  { %v1513_v4 = vpop.eup %1512  ;;  %v798_v5 = vsel %vm66_vm0, %v1511_v3, 0.0 }
 0x5d3   :  { %799 = vadd.xlane.f32.xlu1 %v798_v5  ;;  %v795_v6 = vsel %vm66_vm0, %v1513_v4, 0.0 }
 0x5d4   :  { %796 = vadd.xlane.f32.xlu0 %v795_v6  ;;  %v1227_v6 = vsub.s32 %v1224_v0, %v1789_v9 }
 0x5d5   :  { %v1515_v7 = vpop.eup %1514 }
 0x5d6   :  { %v1517_v8 = vpop.eup %1516  ;;  %v804_v10 = vsel %vm66_vm0, %v1515_v7, 0.0 }
 0x5d7   :  { %805 = vadd.xlane.f32.xlu1 %v804_v10  ;;  %v801_v11 = vsel %vm66_vm0, %v1517_v8, 0.0 }
 0x5d8   :  { %802 = vadd.xlane.f32.xlu0 %v801_v11 }
 0x660   :  { %v800_v14 = vpop.xlane.xlu1 %799 }
 0x661   :  { %1518 = vrcp.f32 %v800_v14  ;;  %v797_v15 = vpop.xlane.xlu0 %796 }
 0x662   :  { %1520 = vrcp.f32 %v797_v15 }
 0x664   :  { %v806_v1 = vpop.xlane.xlu1 %805 }
 0x665   :  { %1522 = vrcp.f32 %v806_v1  ;;  %v803_v16 = vpop.xlane.xlu0 %802 }
 0x666   :  { %1524 = vrcp.f32 %v803_v16 }
 0x66b   :  { %v1519_v42 = vpop.eup %1518 }
 0x66c   :  { %v1521_v19 = vpop.eup %1520  ;;  %v812_v2 = vmul.f32 %v1519_v42, %v1511_v3  ;;  %v1231_v3 = vadd.s32 4294967280, %v1700_v43 }
 0x66d   :  { %v811_v20 = vmul.f32 %v1521_v19, %v1513_v4  ;;  %v1238_v4 = vadd.s32 4294967272, %v1700_v43 }
 0x66f   :  { %v1523_v22 = vpop.eup %1522  ;;  %1421 = vmatprep.mubr.msk.f32.mxu1 %vm66_vm0, %v811_v20  ;;  %v1241_v11 = vsub.s32 %v1238_v4, %v1789_v9 }
 0x670   :  { %v1525_v25 = vpop.eup %1524  ;;  %1422 = vmatmul.mubr.msk.f32.vlgmr.msra.gmra.mrb[2].mxu1 %vm66_vm0, %v812_v2  ;;  %v814_v27 = vmul.f32 %v1523_v22, %v1515_v7  ;;  %v1234_v7 = vsub.s32 %v1231_v3, %v1789_v9 }
 0x671   :  { %v813_v26 = vmul.f32 %v1525_v25, %v1517_v8  ;;  %1430 = vmatpush3.msra.mxu1 %v981_v13  ;;  %1431 = vmatprep.mubr.msk.f32.mxu1 %vm66_vm0, %v1737_v32 }
 0x672   :  { %1492 = vmatprep.subr.bf16.mxu1 %v1491_v21 }
 0x673   :  { %1426 = vmatprep.mubr.msk.f32.mxu0 %vm66_vm0, %v813_v26 }
 0x674   :  { %1427 = vmatmul.mubr.msk.f32.vlgmr.msra.gmra.mrb[10].mxu0 %vm66_vm0, %v814_v27  ;;  %1432 = vmatmul.mubr.msk.f32.vlgmr.msra.gmra.mrb[4].mxu1 %vm66_vm0, %v1742_v33  ;;  %v1527_v33 = vmov 0  }
 0x675   :  { %1494 = vmatpush3.bf16.msra.mxu1 %v1491_v21  ;;  %1434 = vmatprep.mubr.msk.f32.mxu1 %vm66_vm0, %v1753_v40  ;;  %v24_v40 = vstv %s1886_s14 }
 0x676   :  { %1496 = vmatprep.subr.bf16.mxu1 %v1495_v28  ;;  %1509 = vset.pattern.permute.xlu0 %v1527_v33  ;;  %25 = vst [vmem:[#allocation2] sm:$0x1] %v24_v40 }
 0x678   :  { %1435 = vmatmul.mubr.msk.f32.gmra.mrb[6].mxu1 %vm66_vm0, %v1758_v41  ;;  %v1299_v41 = vld [vmem:[%s1887_s12] ss:$0 sm:$0xff] }
 0x679   :  { %1498 = vmatpush3.bf16.msra.mxu1 %v1495_v28 }
 0x67d   :  { %v1202_v59 = vld [vmem:[#allocation2] sm:$0x1] }
 0x743   :  { %v1423_v32 = vpop.f32.mrb[2].mxu1 }
 0x744   :  { %v887_v29 = vpop.f32.mrb[3].mxu1 }
 0x745   :  { %1445 = vmatprep.mubr.msk.f32.mxu1 %vm247_vm2, %v887_v29 }
 0x746   :  { %1446 = vmatmul.mubr.msk.f32.vlgmr.msra.gmra.mrb[4].mxu1 %vm247_vm2, %v1423_v32 }
 0x747   :  { %v1428_v30 = vpop.f32.mrb[10].mxu0 }
 0x748   :  { %v968_v31 = vpop.f32.mrb[11].mxu0 }
 0x749   :  { %1448 = vmatprep.mubr.msk.f32.mxu1 %vm247_vm2, %v968_v31 }
 0x74a   :  { %1449 = vmatmul.mubr.msk.f32.gmra.mrb[6].mxu1 %vm247_vm2, %v1428_v30 }
 0x819   :  { %v1447_v34 = vpop.f32.mrb[4].mxu1 }
 0x81a   :  { %v1172_v35 = vadd.f32 %v1447_v34, %v1299_v41  ;;  %v1145_v36 = vpop.f32.mrb[5].mxu1 }
 0x81b   :  { %v1171_v37 = vadd.f32 %v1299_v41, %v1145_v36 }
 0x81c   :  { %v1176_v39 = vmax.f32 %v1172_v35, 0.0 }
 0x81d   :  { %v1175_v44 = vmax.f32 %v1171_v37, 0.0  ;;  %v1450_v45 = vpop.f32.mrb[6].mxu1 }
 0x81e   :  { %v1174_v46 = vadd.f32 %v1450_v45, %v1299_v41  ;;  %v1155_v47 = vpop.f32.mrb[7].mxu1  ;;  %v1187_v48 = vmul.f32 %v1300_v38, %v1176_v39 }
 0x81f   :  { %v1173_v49 = vadd.f32 %v1299_v41, %v1155_v47  ;;  %v1186_v50 = vmul.f32 %v1300_v38, %v1175_v44 }
 0x820   :  { %v1178_v51 = vmax.f32 %v1174_v46, 0.0  ;;  %v1193_v52 = vsel %vm165_vm1, %v1187_v48, 0.0 }
 0x821   :  { %v1177_v53 = vmax.f32 %v1173_v49, 0.0  ;;  %1194 = vadd.xlane.f32.xlu1 %v1193_v52  ;;  %v1190_v54 = vsel %vm165_vm1, %v1186_v50, 0.0 }
 0x822   :  { %1191 = vadd.xlane.f32.xlu0 %v1190_v54  ;;  %v1189_v55 = vmul.f32 %v1300_v38, %v1178_v51 }
 0x823   :  { %v1188_v56 = vmul.f32 %v1300_v38, %v1177_v53 }
 0x824   :  { %v1199_v57 = vsel %vm165_vm1, %v1189_v55, 0.0 }
 0x825   :  { %1200 = vadd.xlane.f32.xlu1 %v1199_v57  ;;  %v1196_v58 = vsel %vm165_vm1, %v1188_v56, 0.0 }
 0x826   :  { %1197 = vadd.xlane.f32.xlu0 %v1196_v58 }
 0x83c   :  { %1205 = vperm.xlu0 %1509, %v1202_v59  }
 0x8ae   :  { %v1195_v61 = vpop.xlane.xlu1 %1194 }
 0x8af   :  { %v1192_v60 = vpop.xlane.xlu0 %1191 }
 0x8b2   :  { %v1201_v10 = vpop.xlane.xlu1 %1200 }
 0x8b3   :  { %v1198_v62 = vpop.xlane.xlu0 %1197 }
 0x8bb   :  { %v1206_v5 = vpop.permute.xlu0 %1205 }
 0x8bc   :  { %v1211_v8 = vrot.slane %v1206_v5, %v1210_v63 }
 0x8be   :  { %v1212_v13 = vadd.f32 %v1211_v8, %v1192_v60  ;;  %v1213_v14 = vadd.f32 %v1211_v8, %v1195_v61  ;;  %v1214_v15 = vadd.f32 %v1211_v8, %v1198_v62  ;;  %v1215_v1 = vadd.f32 %v1211_v8, %v1201_v10 }
 0x8c0   :  { %v1223_v16 = vrot.slane %v1212_v13, %v1793_v12  ;;  %v1228_v42 = vrot.slane %v1213_v14, %v1227_v6  ;;  %v1235_v17 = vrot.slane %v1214_v15, %v1234_v7  ;;  %v1242_v18 = vrot.slane %v1215_v1, %v1241_v11 }
 0x8c2   :  { %v1230_v43 = vsel %vm1229_vm11, %v1228_v42, %v1223_v16 }
 0x8c3   :  { %v1237_v19 = vsel %vm1236_vm12, %v1235_v17, %v1230_v43 }
 0x8c4   :  { %v1244_v20 = vsel %vm1243_vm13, %v1242_v18, %v1237_v19 }
 0x8c5   :  { %1247 = vst.msk [vmem:[%s1889_s18] sm:$0x1] %vm1246_vm14, %v1244_v20 }

</bundles_post_ra>
